<compile_context>
chip_gen: v7x
topology: tpu7x:2x2x1
jax: 0.10.0
libtpu: 0.0.40
codegen_flags: <defaults>
</compile_context>

<pallas_src>
import jax
import jax.numpy as jnp
from jax.experimental import pallas as pl
from jax.experimental.pallas import tpu as pltpu

D = 2          # BaseNormal uses torch.eye(2) as covariance -> D == 2
N_FLOWS = 2    # default n_flows
LANES = 128
P_STRIDE = 2 * D + 2   # per-flow scalars in SMEM: [w0, w1, u0, u1, b, <w,u>]


def planar_chain_kernel(p_ref, z_ref, out_ref):
    """Apply N_FLOWS planar flows to one packed tile and write a fused slab.

    SMEM:
      p_ref  : (N_FLOWS * P_STRIDE,) f32 flat params [w0,w1,u0,u1,b,<w,u>]*flow
    VMEM (sample axis packed on sublanes x lanes):
      z_ref  : (D,   R, 128)  base samples
      out_ref: (D+1, R, 128)  rows 0..D-1 = transformed z, row D = sum log|det|
    """
    z0 = z_ref[0]                         # (R, 128) dense slab
    z1 = z_ref[1]                         # (R, 128)
    det = jnp.ones(z0.shape, jnp.float32)

    # Static unroll over the (small) number of flows; operands are either
    # (R, 128) vreg slabs or SMEM scalars that splat -> pure VPU FMAs + EUP.
    for i in range(N_FLOWS):
        w0 = p_ref[P_STRIDE * i + 0]
        w1 = p_ref[P_STRIDE * i + 1]
        u0 = p_ref[P_STRIDE * i + 2]
        u1 = p_ref[P_STRIDE * i + 3]
        b = p_ref[P_STRIDE * i + 4]
        wu = p_ref[P_STRIDE * i + 5]      # precomputed <w, u>

        lin = w0 * z0 + w1 * z1 + b       # <z, w> + b  (no cross-lane reduce)
        h = jnp.tanh(lin)                 # EUP
        h_prime = 1.0 - h * h

        # |det J_i| = |1 + h'(lin) * <w, u>| on z BEFORE the update.
        det = det * (1.0 + h_prime * wu)

        # planar flow forward: z + u * tanh(<z, w> + b)
        z0 = z0 + u0 * h
        z1 = z1 + u1 * h

    out_ref[0] = z0
    out_ref[1] = z1
    out_ref[D] = jnp.log(jnp.abs(det))    # single log for the whole chain


def _choose_tiling(n):
    """Pick (rows_pad, r_tile, grid) for sample count n.

    rows = n samples packed 128-per-row.  r_tile is a multiple of 8 (or the
    full row count for tiny n), blocks are ~1 MiB in / ~1.5 MiB out, and the
    grid has >= 2 steps whenever there is enough work (v7x megacore).
    """
    R_TARGET = 1024                       # rows/block -> ~1 MiB z-in per block
    rows = pl.cdiv(n, LANES)
    if rows < 16:
        g, r_tile = 1, rows               # block sublane dim == full array dim
    else:
        g = max(2, pl.cdiv(rows, R_TARGET))
        r_tile = pl.cdiv(pl.cdiv(rows, g), 8) * 8
    rows_pad = g * r_tile
    return rows_pad, r_tile, g


def sample_base_packed(key, rows_pad, mu, var):
    """Sample MV(mu, var) directly in the packed (D, rows_pad, 128) layout."""
    eps = jax.random.normal(key, (D, rows_pad, LANES), dtype=jnp.float32)
    L = jnp.linalg.cholesky(var).astype(jnp.float32)          # (D, D)
    return mu.reshape(D, 1, 1).astype(jnp.float32) + jnp.einsum(
        "ij,jrl->irl", L, eps)


def normalizing_flow_forward(key, n, mu, var, W, U, B):
    """Full forward: sample base normal (JAX glue), then run the Pallas kernel.

    Returns (z_out (n, D) f32, sum_log_det (n, 1) f32), matching the PyTorch
    module's output layout.
    """
    rows_pad, r_tile, grid_n = _choose_tiling(n)

    # Base samples, produced directly in the kernel's packed layout (no
    # transpose/pad HBM pass).  Padded entries are real samples, sliced away.
    z0_packed = sample_base_packed(key, rows_pad, mu, var)    # (D, rows_pad, 128)

    # Flow params -> one flat f32 SMEM array: per flow [w0, w1, u0, u1, b, <w,u>]
    wu = jnp.sum(W * U, axis=-1, keepdims=True)               # (N_FLOWS, 1)
    params = jnp.concatenate(
        [W, U, B, wu], axis=1).reshape(-1).astype(jnp.float32)  # (N_FLOWS*6,)

    n_tot = rows_pad * LANES
    cost = pl.CostEstimate(
        flops=14 * N_FLOWS * n_tot,
        transcendentals=(N_FLOWS + 1) * n_tot,                # tanh per flow + 1 log
        bytes_accessed=(2 * D + 1) * n_tot * 4,               # read D, write D+1
    )

    fused = pl.pallas_call(
        planar_chain_kernel,
        out_shape=jax.ShapeDtypeStruct((D + 1, rows_pad, LANES), jnp.float32),
        grid=(grid_n,),
        in_specs=[
            pl.BlockSpec(memory_space=pltpu.MemorySpace.SMEM),        # params
            pl.BlockSpec((D, r_tile, LANES), lambda i: (0, i, 0)),    # z block
        ],
        out_specs=pl.BlockSpec((D + 1, r_tile, LANES), lambda i: (0, i, 0)),
        compiler_params=pltpu.CompilerParams(
            dimension_semantics=("parallel",)),                       # v7x: 2 TCs
        cost_estimate=cost,
    )(params, z0_packed)

    # Back to PyTorch layout: (n, D) and (n, 1), dropping packing padding.
    z_out = fused[:D].reshape(D, n_tot)[:, :n].T
    sum_log_det = fused[D].reshape(n_tot)[:n, None]
    return z_out, sum_log_det


def reference_forward(z0, W, U, B):
    """Pure-JAX reference of the planar-flow chain for correctness checking."""
    z = z0
    sld = jnp.zeros((z.shape[0], 1), jnp.float32)
    for i in range(N_FLOWS):
        w = W[i:i + 1, :]
        u = U[i:i + 1, :]
        b = B[i:i + 1, :]
        lin = z @ w.T + b
        h = jnp.tanh(lin)
        hp = 1.0 - h ** 2
        psi = hp * w
        inner = 1.0 + psi @ u.T
        sld = sld + jnp.log(jnp.abs(inner))
        z = z + u * h
    return z, sld


if __name__ == "__main__":
    key = jax.random.PRNGKey(0)
    k_sample, k_w, k_u, k_b = jax.random.split(key, 4)

    # Deterministic parameter init (mirrors the module's __init__ shapes):
    mu = jnp.ones((1, D), dtype=jnp.float32)                  # BaseNormal.mu
    var = jnp.eye(2, dtype=jnp.float32)                       # BaseNormal.var
    W = jax.random.uniform(k_w, (N_FLOWS, D), jnp.float32, -0.01, 0.01)
    U = jax.random.uniform(k_u, (N_FLOWS, D), jnp.float32, -0.01, 0.01)
    B = jax.random.uniform(k_b, (N_FLOWS, 1), jnp.float32, -0.01, 0.01)

    ok = True
    for n in (8, 2000):                   # tiny demo + a multi-tile (grid>=2) case
        z_out, sum_log_det = normalizing_flow_forward(k_sample, n, mu, var, W, U, B)
        z_out = jax.block_until_ready(z_out)
        sum_log_det = jax.block_until_ready(sum_log_det)

        # Reference on the SAME base samples (same key, same packed sampling).
        rows_pad, _, _ = _choose_tiling(n)
        z0_packed = sample_base_packed(k_sample, rows_pad, mu, var)
        z0 = z0_packed.reshape(D, rows_pad * LANES)[:, :n].T   # (n, D)
        z_ref, sld_ref = reference_forward(z0, W, U, B)

        ok &= (z_out.shape == (n, D) and sum_log_det.shape == (n, 1))
        ok &= bool(jnp.allclose(z_out, z_ref, atol=1e-5, rtol=1e-5))
        ok &= bool(jnp.allclose(sum_log_det, sld_ref, atol=1e-5, rtol=1e-5))

    assert ok
    print("KERNEL_OK")
</pallas_src>

<mosaic_0001>
module attributes {stable_mosaic.version = 11 : i64} {
  func.func @planar_chain_kernel(%arg0: i32, %arg1: memref<12xf32, #tpu.memory_space<smem>>, %arg2: memref<2x1x128xf32, #tpu.memory_space<vmem>>, %arg3: memref<3x1x128xf32, #tpu.memory_space<vmem>>) attributes {dimension_semantics = [#tpu.dimension_semantics<parallel>], iteration_bounds = array<i64: 1>, scalar_prefetch = 0 : i64, scratch_operands = 0 : i64, tpu.core_type = #tpu.core_type<tc>, window_params = [{transform_indices = @transform_0, window_bounds = array<i64: 12>}, {transform_indices = @transform_1, window_bounds = array<i64: 2, 1, 128>}, {transform_indices = @transform_2, window_bounds = array<i64: 3, 1, 128>}]} {
    %c0 = arith.constant 0 : index
    %c0_0 = arith.constant 0 : index
    %c0_1 = arith.constant 0 : index
    %0 = vector.load %arg2[%c0, %c0_0, %c0_1] : memref<2x1x128xf32, #tpu.memory_space<vmem>>, vector<1x1x128xf32>
    %1 = vector.shape_cast %0 : vector<1x1x128xf32> to vector<1x128xf32>
    %c1 = arith.constant 1 : index
    %c0_2 = arith.constant 0 : index
    %c0_3 = arith.constant 0 : index
    %2 = vector.load %arg2[%c1, %c0_2, %c0_3] : memref<2x1x128xf32, #tpu.memory_space<vmem>>, vector<1x1x128xf32>
    %3 = vector.shape_cast %2 : vector<1x1x128xf32> to vector<1x128xf32>
    %cst = arith.constant 1.000000e+00 : f32
    %4 = vector.broadcast %cst : f32 to vector<1x128xf32>
    %c0_4 = arith.constant 0 : index
    %5 = memref.load %arg1[%c0_4] : memref<12xf32, #tpu.memory_space<smem>>
    %c1_5 = arith.constant 1 : index
    %6 = memref.load %arg1[%c1_5] : memref<12xf32, #tpu.memory_space<smem>>
    %c2 = arith.constant 2 : index
    %7 = memref.load %arg1[%c2] : memref<12xf32, #tpu.memory_space<smem>>
    %c3 = arith.constant 3 : index
    %8 = memref.load %arg1[%c3] : memref<12xf32, #tpu.memory_space<smem>>
    %c4 = arith.constant 4 : index
    %9 = memref.load %arg1[%c4] : memref<12xf32, #tpu.memory_space<smem>>
    %c5 = arith.constant 5 : index
    %10 = memref.load %arg1[%c5] : memref<12xf32, #tpu.memory_space<smem>>
    %11 = vector.broadcast %5 : f32 to vector<1x128xf32>
    %12 = arith.mulf %11, %1 : vector<1x128xf32>
    %13 = vector.broadcast %6 : f32 to vector<1x128xf32>
    %14 = arith.mulf %13, %3 : vector<1x128xf32>
    %15 = arith.addf %12, %14 : vector<1x128xf32>
    %16 = vector.broadcast %9 : f32 to vector<1x128xf32>
    %17 = arith.addf %15, %16 : vector<1x128xf32>
    %18 = math.tanh %17 : vector<1x128xf32>
    %19 = arith.mulf %18, %18 : vector<1x128xf32>
    %cst_6 = arith.constant 1.000000e+00 : f32
    %20 = vector.broadcast %cst_6 : f32 to vector<1x128xf32>
    %21 = arith.subf %20, %19 : vector<1x128xf32>
    %22 = vector.broadcast %10 : f32 to vector<1x128xf32>
    %23 = arith.mulf %21, %22 : vector<1x128xf32>
    %cst_7 = arith.constant 1.000000e+00 : f32
    %24 = vector.broadcast %cst_7 : f32 to vector<1x128xf32>
    %25 = arith.addf %24, %23 : vector<1x128xf32>
    %26 = arith.mulf %4, %25 : vector<1x128xf32>
    %27 = vector.broadcast %7 : f32 to vector<1x128xf32>
    %28 = arith.mulf %27, %18 : vector<1x128xf32>
    %29 = arith.addf %1, %28 : vector<1x128xf32>
    %30 = vector.broadcast %8 : f32 to vector<1x128xf32>
    %31 = arith.mulf %30, %18 : vector<1x128xf32>
    %32 = arith.addf %3, %31 : vector<1x128xf32>
    %c6 = arith.constant 6 : index
    %33 = memref.load %arg1[%c6] : memref<12xf32, #tpu.memory_space<smem>>
    %c7 = arith.constant 7 : index
    %34 = memref.load %arg1[%c7] : memref<12xf32, #tpu.memory_space<smem>>
    %c8 = arith.constant 8 : index
    %35 = memref.load %arg1[%c8] : memref<12xf32, #tpu.memory_space<smem>>
    %c9 = arith.constant 9 : index
    %36 = memref.load %arg1[%c9] : memref<12xf32, #tpu.memory_space<smem>>
    %c10 = arith.constant 10 : index
    %37 = memref.load %arg1[%c10] : memref<12xf32, #tpu.memory_space<smem>>
    %c11 = arith.constant 11 : index
    %38 = memref.load %arg1[%c11] : memref<12xf32, #tpu.memory_space<smem>>
    %39 = vector.broadcast %33 : f32 to vector<1x128xf32>
    %40 = arith.mulf %39, %29 : vector<1x128xf32>
    %41 = vector.broadcast %34 : f32 to vector<1x128xf32>
    %42 = arith.mulf %41, %32 : vector<1x128xf32>
    %43 = arith.addf %40, %42 : vector<1x128xf32>
    %44 = vector.broadcast %37 : f32 to vector<1x128xf32>
    %45 = arith.addf %43, %44 : vector<1x128xf32>
    %46 = math.tanh %45 : vector<1x128xf32>
    %47 = arith.mulf %46, %46 : vector<1x128xf32>
    %cst_8 = arith.constant 1.000000e+00 : f32
    %48 = vector.broadcast %cst_8 : f32 to vector<1x128xf32>
    %49 = arith.subf %48, %47 : vector<1x128xf32>
    %50 = vector.broadcast %38 : f32 to vector<1x128xf32>
    %51 = arith.mulf %49, %50 : vector<1x128xf32>
    %cst_9 = arith.constant 1.000000e+00 : f32
    %52 = vector.broadcast %cst_9 : f32 to vector<1x128xf32>
    %53 = arith.addf %52, %51 : vector<1x128xf32>
    %54 = arith.mulf %26, %53 : vector<1x128xf32>
    %55 = vector.broadcast %35 : f32 to vector<1x128xf32>
    %56 = arith.mulf %55, %46 : vector<1x128xf32>
    %57 = arith.addf %29, %56 : vector<1x128xf32>
    %58 = vector.broadcast %36 : f32 to vector<1x128xf32>
    %59 = arith.mulf %58, %46 : vector<1x128xf32>
    %60 = arith.addf %32, %59 : vector<1x128xf32>
    %c0_10 = arith.constant 0 : index
    %c0_11 = arith.constant 0 : index
    %c0_12 = arith.constant 0 : index
    %61 = vector.load %arg3[%c0_10, %c0_11, %c0_12] : memref<3x1x128xf32, #tpu.memory_space<vmem>>, vector<1x1x128xf32>
    %62 = vector.shape_cast %61 : vector<1x1x128xf32> to vector<1x128xf32>
    %63 = vector.shape_cast %57 : vector<1x128xf32> to vector<1x1x128xf32>
    tpu.vector_store %arg3[%c0_10, %c0_11, %c0_12], %63 {strides = array<i32>} : memref<3x1x128xf32, #tpu.memory_space<vmem>>, vector<1x1x128xf32>,
    %c1_13 = arith.constant 1 : index
    %c0_14 = arith.constant 0 : index
    %c0_15 = arith.constant 0 : index
    %64 = vector.load %arg3[%c1_13, %c0_14, %c0_15] : memref<3x1x128xf32, #tpu.memory_space<vmem>>, vector<1x1x128xf32>
    %65 = vector.shape_cast %64 : vector<1x1x128xf32> to vector<1x128xf32>
    %66 = vector.shape_cast %60 : vector<1x128xf32> to vector<1x1x128xf32>
    tpu.vector_store %arg3[%c1_13, %c0_14, %c0_15], %66 {strides = array<i32>} : memref<3x1x128xf32, #tpu.memory_space<vmem>>, vector<1x1x128xf32>,
    %67 = math.absf %54 : vector<1x128xf32>
    %68 = math.log %67 : vector<1x128xf32>
    %c2_16 = arith.constant 2 : index
    %c0_17 = arith.constant 0 : index
    %c0_18 = arith.constant 0 : index
    %69 = vector.load %arg3[%c2_16, %c0_17, %c0_18] : memref<3x1x128xf32, #tpu.memory_space<vmem>>, vector<1x1x128xf32>
    %70 = vector.shape_cast %69 : vector<1x1x128xf32> to vector<1x128xf32>
    %71 = vector.shape_cast %68 : vector<1x128xf32> to vector<1x1x128xf32>
    tpu.vector_store %arg3[%c2_16, %c0_17, %c0_18], %71 {strides = array<i32>} : memref<3x1x128xf32, #tpu.memory_space<vmem>>, vector<1x1x128xf32>,
    return
  }
  func.func @transform_0(%arg0: i32) -> i32 {
    %c0_i32 = arith.constant 0 : i32
    %c0_i32_0 = arith.constant 0 : i32
    return %c0_i32 : i32
  }
  func.func @transform_1(%arg0: i32) -> (i32, i32, i32) {
    %c0_i32 = arith.constant 0 : i32
    %c0_i32_0 = arith.constant 0 : i32
    %c0_i32_1 = arith.constant 0 : i32
    return %c0_i32, %arg0, %c0_i32_0 : i32, i32, i32
  }
  func.func @transform_2(%arg0: i32) -> (i32, i32, i32) {
    %c0_i32 = arith.constant 0 : i32
    %c0_i32_0 = arith.constant 0 : i32
    %c0_i32_1 = arith.constant 0 : i32
    return %c0_i32, %arg0, %c0_i32_0 : i32, i32, i32
  }
}

</mosaic_0001>

<bundles_post_ra>
// kernel: tpu_custom_call.1
= control target key start
LH: loop header
LB: loop body
LE: loop exit
PB: predicated region body
PF: predicated region fallthrough
CT: control target
= control target key end

     0   :  { %7 = vsyncpa [#allocation4], 0  ;;  %s209_s0 = inlined_call_operand.hbm [shape: f32[12], index: 0, kind: input, shape index: {}]   ;;  %s210_s1 = inlined_call_operand.vmem [shape: f32[2,1,128], index: 1, kind: input, shape index: {}]   ;;  %s211_s2 = inlined_call_operand.hbm [shape: f32[3,1,128], index: 2, kind: output, shape index: {}]  }
   0x1   :  { %8 = vsyncpa [#allocation3], 0  ;;  %s124_s11 = scalar_lea.hbm %s209_s0, 16 }
   0x2   :  { %p125_p0 = scmp.ne.s32.totalorder %s209_s0, %s124_s11  ;;  %p128_p1 = scmp.lt.u32.totalorder %s124_s11, %s209_s0 }
   0x4   :  { %p130_p2 = pnand %p128_p1, %p125_p0 }
   0x6   :  { %133 = shalt.err (!%p130_p2)
}
   0x7   :  { %s160_s16 = smov [#allocation2]  }
   0x8   :  { %16 = dma.hbm_to_smem %s209_s0, 16, %s160_s16, [#allocation4]  }
   0x9   :  { %156 = dma.done.wait [#allocation4], 16  }
   0xa   :  { %157 = vsyncadd [#allocation4], 4294967280 }
   0xb   :  { %22 = sfence }
   0xc   :  { %s26_s19 = sld [smem:[#allocation2]]  ;;  %s103_s20 = sld [smem:[#allocation2 + $0x1]]  ;;  %v23_v0 = vld [vmem:[%s210_s1] sm:$0x1]  ;;  %v102_v1 = vld [vmem:[%s210_s1 + $0x1] sm:$0x1] }
   0xd   :  { %s106_s21 = sld [smem:[#allocation2 + $0x4]]  ;;  %s104_s0 = sld [smem:[#allocation2 + $0x2]] }
   0xe   :  { %s105_s26 = sld [smem:[#allocation2 + $0x3]]  ;;  %s108_s27 = sld [smem:[#allocation2 + $0x6]] }
   0xf   :  { %s109_s28 = sld [smem:[#allocation2 + $0x7]]  ;;  %s112_s29 = sld [smem:[#allocation2 + $0xa]] }
  0x10   :  { %s110_s1 = sld [smem:[#allocation2 + $0x8]]  ;;  %s111_s30 = sld [smem:[#allocation2 + $0x9]] }
  0x11   :  { %s107_s3 = sld [smem:[#allocation2 + $0x5]]  ;;  %s113_s4 = sld [smem:[#allocation2 + $0xb]] }
  0x12   :  { %v32_v2 = vstv %s26_s19  ;;  %v34_v4 = vstv %s103_s20  ;;  %s161_s5 = smov [#allocation5]  }
  0x13   :  { %v33_v3 = vmul.f32 %v32_v2, %v23_v0  ;;  %v35_v5 = vmul.f32 %v102_v1, %v34_v4  ;;  %v37_v6 = vstv %s106_s21  ;;  %v45_v9 = vstv %s104_s0  ;;  %s90_s6 = sshll.u32 %s161_s5, 4  ;;  %s91_s6 = int_to_ptr.vmem [resolvable:$true] %s90_s6 }
  0x14   :  { %v48_v10 = vstv %s105_s26  ;;  %v57_v14 = vstv %s108_s27  ;;  %s134_s7 = scalar_lea.vmem %s91_s6, 48  ;;  %s138_s8 = scalar_lea.vmem %s91_s6, 64 }
  0x15   :  { %v36_v7 = vadd.f32 %v35_v5, %v33_v3  ;;  %v59_v15 = vstv %s109_s28  ;;  %v62_v20 = vstv %s112_s29  ;;  %p135_p3 = scmp.ne.s32.totalorder %s91_s6, %s134_s7  ;;  %p139_p4 = scmp.lt.s32.totalorder %s91_s6, %s91_s6 }
  0x16   :  { %v71_v25 = vstv %s110_s1  ;;  %v74_v26 = vstv %s111_s30  ;;  %p140_p5 = scmp.lt.s32.totalorder %s138_s8, %s134_s7 }
  0x17   :  { %v38_v8 = vadd.f32 %v37_v6, %v36_v7  ;;  %v42_v27 = vstv %s107_s3  ;;  %v67_v33 = vstv %s113_s4 }
  0x18   :  { %p141_p6 = por %p140_p5, %p139_p4 }
  0x19   :  { %118 = vtanh.f32 %v38_v8 }
  0x1a   :  { %p142_p7 = pnand %p141_p6, %p135_p3 }
  0x23   :  { %v119_v11 = vpop.eup %118 }
  0x24   :  { %v46_v12 = vmul.f32 %v119_v11, %v45_v9  ;;  %v49_v13 = vmul.f32 %v119_v11, %v48_v10  ;;  %v40_v23 = vmul.f32 %v119_v11, %v119_v11 }
  0x26   :  { %v47_v16 = vadd.f32 %v46_v12, %v23_v0  ;;  %v50_v17 = vadd.f32 %v102_v1, %v49_v13  ;;  %v41_v24 = vsub.f32 1.0, %v40_v23 }
  0x28   :  { %v58_v18 = vmul.f32 %v57_v14, %v47_v16  ;;  %v60_v19 = vmul.f32 %v59_v15, %v50_v17  ;;  %v43_v31 = vmul.f32 %v42_v27, %v41_v24 }
  0x2a   :  { %v61_v21 = vadd.f32 %v60_v19, %v58_v18  ;;  %v44_v37 = vadd.f32 1.0, %v43_v31 }
  0x2c   :  { %v63_v22 = vadd.f32 %v62_v20, %v61_v21 }
  0x2e   :  { %120 = vtanh.f32 %v63_v22 }
  0x38   :  { %v121_v28 = vpop.eup %120 }
  0x39   :  { %v72_v29 = vmul.f32 %v121_v28, %v71_v25  ;;  %v75_v30 = vmul.f32 %v121_v28, %v74_v26  ;;  %v65_v32 = vmul.f32 %v121_v28, %v121_v28 }
  0x3b   :  { %v73_v34 = vadd.f32 %v72_v29, %v47_v16  ;;  %v76_v35 = vadd.f32 %v75_v30, %v50_v17  ;;  %v66_v36 = vsub.f32 1.0, %v65_v32 }
  0x3d   :  { %77 = vst [vmem:[#allocation5] sm:$0x1] %v73_v34  ;;  %79 = vst [vmem:[#allocation5 + $0x1] sm:$0x1] %v76_v35  ;;  %v68_v38 = vmul.f32 %v67_v33, %v66_v36 }
  0x3f   :  { %v69_v39 = vadd.f32 1.0, %v68_v38 }
  0x41   :  { %v70_v40 = vmul.f32 %v69_v39, %v44_v37 }
  0x43   :  { %v80_v41 = vand.u32 2147483647, %v70_v40 }
  0x45   :  { %122 = vlog2.f32 %v80_v41 }
  0x4f   :  { %v123_v42 = vpop.eup %122 }
  0x50   :  { %v82_v43 = vmul.f32 0.6931472, %v123_v42 }
  0x52   :  { %84 = vst [vmem:[#allocation5 + $0x2] sm:$0x1] %v82_v43 }
  0x53   :  { %145 = shalt.err (!%p142_p7)
}
  0x54   :  { %s146_s11 = scalar_lea.hbm %s211_s2, 48 }
  0x55   :  { %p147_p8 = scmp.ne.s32.totalorder %s211_s2, %s146_s11  ;;  %p150_p9 = scmp.lt.u32.totalorder %s146_s11, %s211_s2 }
  0x57   :  { %p152_p10 = pnand %p150_p9, %p147_p8 }
  0x59   :  { %155 = shalt.err (!%p152_p10)
}
  0x5a   :  { %s162_s16 = smov 16   ;;  %s163_s17 = smov 1  }
  0x5b   :  { %96 = dma.vmem_to_hbm [thread:$0]  %s91_s6, 48, %s211_s2, [#allocation3], %s162_s16, %s162_s16, %s163_s17  }
  0x5c   :  { %158 = dma.done.wait [#allocation3], 48  }
  0x5d   :  { %159 = vsyncadd [#allocation3], 4294967248 }
  0x5e   :  { %100 = vsyncpa [#allocation3], 1 }
  0x5f   :  { %101 = vsyncpa [#allocation4], 1 }

</bundles_post_ra>
